<compile_context>
chip_gen: v5e
topology: v5e:2x2
jax: 0.10.0
libtpu: 0.0.40
codegen_flags: <defaults>
</compile_context>

<pallas_src>
import functools

import jax
import jax.numpy as jnp
from jax.experimental import pallas as pl
from jax.experimental.pallas import tpu as pltpu

_DEFAULT_BLOCK_BUDGET = 2 * 1024 * 1024  # ~2 MiB/block: safe on v5e/v6e/v7x.


def _sublane_align(dtype):
    # Native sublane packing: f32 -> 8, bf16 -> 16, int8/fp8 -> 32.
    return max(8, 32 // jnp.dtype(dtype).itemsize)


def _pixel_norm_lane_kernel(x_ref, o_ref, *, eps):
    # x_ref/o_ref: (block_m, C) tiles; channels on lanes, rows independent.
    x = x_ref[...].astype(jnp.float32)
    ms = jnp.mean(x * x, axis=-1, keepdims=True)                  # lane reduce (XLU)
    o_ref[...] = (x * jax.lax.rsqrt(ms + eps)).astype(o_ref.dtype)  # rsqrt on EUP


def _pixel_norm_sublane_kernel(x_ref, o_ref, *, eps):
    # x_ref/o_ref: (1, C, block_l) tiles; channels on sublanes, spatial on lanes.
    x = x_ref[...].astype(jnp.float32)
    ms = jnp.mean(x * x, axis=1, keepdims=True)                   # sublane reduce
    o_ref[...] = (x * jax.lax.rsqrt(ms + eps)).astype(o_ref.dtype)


def _pixel_norm_2d(x2d, *, eps, budget_bytes):
    """PixelNorm over the last axis of a 2-D array (rows independent)."""
    M, C = x2d.shape
    itemsize = jnp.dtype(x2d.dtype).itemsize
    align = _sublane_align(x2d.dtype)

    # Size the row tile purely by bytes; no row cap.
    tm = budget_bytes // max(1, C * itemsize)
    tm = max(align, (tm // align) * align)
    # TODO(synk): if a single row (C) alone exceeds the VMEM budget, a second
    # grid axis over C with an accumulator would be needed; not relevant for
    # PixelNorm's typical channel counts.

    if M <= tm:
        block_m, grid_m = M, 1                      # full extent (any M OK)
    else:
        block_m, grid_m = tm, pl.cdiv(M, tm)        # ragged last block is masked

    return pl.pallas_call(
        functools.partial(_pixel_norm_lane_kernel, eps=eps),
        out_shape=jax.ShapeDtypeStruct((M, C), x2d.dtype),
        grid=(grid_m,),
        in_specs=[pl.BlockSpec((block_m, C), lambda i: (i, 0))],
        out_specs=pl.BlockSpec((block_m, C), lambda i: (i, 0)),
        compiler_params=pltpu.CompilerParams(
            dimension_semantics=("parallel",)),
        cost_estimate=pl.CostEstimate(
            flops=3 * M * C,
            transcendentals=M,
            bytes_accessed=2 * M * C * itemsize),
    )(x2d)


def _pixel_norm_ncl(x3, *, eps, budget_bytes):
    """PixelNorm over axis=1 of a (N, C, L) array; spatial axis L on lanes."""
    N, C, L = x3.shape
    itemsize = jnp.dtype(x3.dtype).itemsize

    # Lane tile sized by bytes, multiple of 128 for unmasked stores.
    tl = budget_bytes // max(1, C * itemsize)
    tl = max(128, (tl // 128) * 128)
    # TODO(synk): for extremely large C a (C, 128) column may exceed VMEM;
    # would need a C-split with an accumulator (not a realistic PixelNorm case).

    if L <= tl:
        block_l, grid_l = L, 1                      # full extent (any L OK)
    else:
        block_l, grid_l = tl, pl.cdiv(L, tl)        # ragged last block is masked

    return pl.pallas_call(
        functools.partial(_pixel_norm_sublane_kernel, eps=eps),
        out_shape=jax.ShapeDtypeStruct((N, C, L), x3.dtype),
        grid=(N, grid_l),
        in_specs=[pl.BlockSpec((1, C, block_l), lambda n, l: (n, 0, l))],
        out_specs=pl.BlockSpec((1, C, block_l), lambda n, l: (n, 0, l)),
        compiler_params=pltpu.CompilerParams(
            dimension_semantics=("parallel", "parallel")),
        cost_estimate=pl.CostEstimate(
            flops=3 * N * C * L,
            transcendentals=N * L,
            bytes_accessed=2 * N * C * L * itemsize),
    )(x3)


def pixel_norm(x, eps=1e-8, block_budget_bytes=_DEFAULT_BLOCK_BUDGET):
    """out = x * rsqrt(mean(x**2, dim=1, keepdim=True) + eps) (dim=1 = channels)."""
    if x.ndim < 2:
        raise ValueError("PixelNorm expects at least 2 dims")
    if x.ndim == 2:
        # Channel axis is already last -> lane-dense directly.
        return _pixel_norm_2d(x, eps=eps, budget_bytes=block_budget_bytes)
    # N-D (e.g. NCHW): (N, C, H, W) -> (N, C, H*W) is a free contiguous reshape;
    # no transpose round-trip.  Reduce over C on sublanes, spatial on lanes.
    N, C = x.shape[0], x.shape[1]
    L = 1
    for d in x.shape[2:]:
        L *= int(d)
    out3 = _pixel_norm_ncl(x.reshape(N, C, L), eps=eps,
                           budget_bytes=block_budget_bytes)
    return out3.reshape(x.shape)


def _reference(x, eps=1e-8):
    return x * jax.lax.rsqrt(jnp.mean(x * x, axis=1, keepdims=True) + eps)


if __name__ == "__main__":
    key = jax.random.PRNGKey(0)
    k1, k2, k3, k4 = jax.random.split(key, 4)

    # 2-D latent case (StyleGAN2 mapping-network input): (batch, style_dim).
    z = jax.random.normal(k1, (8, 512), dtype=jnp.float32)
    out_z = jax.block_until_ready(pixel_norm(z))
    assert out_z.shape == z.shape
    assert jnp.allclose(out_z, _reference(z), atol=1e-5, rtol=1e-5)

    # 4-D feature-map case: (batch, channels, H, W), normalized over channels.
    x = jax.random.normal(k2, (2, 4, 16, 16), dtype=jnp.float32)
    out_x = jax.block_until_ready(pixel_norm(x))
    assert out_x.shape == x.shape
    assert jnp.allclose(out_x, _reference(x), atol=1e-5, rtol=1e-5)

    # Ragged row grid (M % block_m != 0): tiny budget forces block_m=8, grid=3.
    r = jax.random.normal(k3, (20, 32), dtype=jnp.float32)
    out_r = jax.block_until_ready(pixel_norm(r, block_budget_bytes=1024))
    assert jnp.allclose(out_r, _reference(r), atol=1e-5, rtol=1e-5)

    # Ragged lane grid on the N-D path (H*W=169, block_l=128 -> masked last block).
    y = jax.random.normal(k4, (2, 4, 13, 13), dtype=jnp.float32)
    out_y = jax.block_until_ready(pixel_norm(y, block_budget_bytes=2048))
    assert jnp.allclose(out_y, _reference(y), atol=1e-5, rtol=1e-5)

    print("KERNEL_OK")
</pallas_src>

<mosaic_0001>
module attributes {stable_mosaic.version = 11 : i64} {
  func.func @_pixel_norm_lane_kernel(%arg0: i32, %arg1: memref<8x512xf32, #tpu.memory_space<vmem>>, %arg2: memref<8x512xf32, #tpu.memory_space<vmem>>) attributes {dimension_semantics = [#tpu.dimension_semantics<parallel>], iteration_bounds = array<i64: 1>, scalar_prefetch = 0 : i64, scratch_operands = 0 : i64, tpu.core_type = #tpu.core_type<tc>, window_params = [{transform_indices = @transform_0, window_bounds = array<i64: 8, 512>}, {transform_indices = @transform_1, window_bounds = array<i64: 8, 512>}]} {
    %c0 = arith.constant 0 : index
    %c0_0 = arith.constant 0 : index
    %0 = vector.load %arg1[%c0, %c0_0] : memref<8x512xf32, #tpu.memory_space<vmem>>, vector<8x512xf32>
    %1 = arith.mulf %0, %0 : vector<8x512xf32>
    %cst = arith.constant dense<0.000000e+00> : vector<8xf32>
    %2 = vector.multi_reduction <add>, %1, %cst [1] : vector<8x512xf32> to vector<8xf32>
    %3 = vector.shape_cast %2 : vector<8xf32> to vector<8x1xf32>
    %cst_1 = arith.constant 5.120000e+02 : f32
    %4 = vector.broadcast %cst_1 : f32 to vector<8x1xf32>
    %5 = arith.divf %3, %4 : vector<8x1xf32>
    %cst_2 = arith.constant 9.99999993E-9 : f32
    %6 = vector.broadcast %cst_2 : f32 to vector<8x1xf32>
    %7 = arith.addf %5, %6 : vector<8x1xf32>
    %8 = math.rsqrt %7 : vector<8x1xf32>
    %9 = vector.broadcast %8 : vector<8x1xf32> to vector<8x512xf32>
    %10 = arith.mulf %0, %9 : vector<8x512xf32>
    %c0_3 = arith.constant 0 : index
    %c0_4 = arith.constant 0 : index
    %11 = vector.load %arg2[%c0_3, %c0_4] : memref<8x512xf32, #tpu.memory_space<vmem>>, vector<8x512xf32>
    tpu.vector_store %arg2[%c0_3, %c0_4], %10 {strides = array<i32>} : memref<8x512xf32, #tpu.memory_space<vmem>>, vector<8x512xf32>,
    return
  }
  func.func @transform_0(%arg0: i32) -> (i32, i32) {
    %c0_i32 = arith.constant 0 : i32
    %c0_i32_0 = arith.constant 0 : i32
    return %arg0, %c0_i32 : i32, i32
  }
  func.func @transform_1(%arg0: i32) -> (i32, i32) {
    %c0_i32 = arith.constant 0 : i32
    %c0_i32_0 = arith.constant 0 : i32
    return %arg0, %c0_i32 : i32, i32
  }
}

</mosaic_0001>

<bundles_post_ra>
// kernel: tpu_custom_call.1
= control target key start
LH: loop header
LB: loop body
LE: loop exit
PB: predicated region body
PF: predicated region fallthrough
CT: control target
= control target key end

     0   :  { %6 = vsyncpa [#allocation3], 0  ;;  %s158_s0 = inlined_call_operand.hbm [shape: f32[8,512], index: 0, kind: input, shape index: {}]   ;;  %s159_s1 = inlined_call_operand.hbm [shape: f32[8,512], index: 1, kind: output, shape index: {}]  }
   0x1   :  { %7 = vsyncpa [#allocation4], 0  ;;  %s13_s8 = sshll.u32 %s158_s0, 4  ;;  %s139_s9 = smov [#allocation2]   ;;  %s14_s8 = int_to_ptr.hbm [resolvable:$true] %s13_s8 }
   0x2   :  { %s15_s10 = sshll.u32 %s139_s9, 4  ;;  %s16_s10 = int_to_ptr.vmem [resolvable:$true] %s15_s10 }
   0x3   :  { %18 = dma.hbm_to_vmem [thread:$0]  %s14_s8, 512, %s16_s10, [#allocation3]  }
   0x4   :  { %135 = dma.done.wait [#allocation3], 512  }
   0x5   :  { %136 = vsyncadd [#allocation3], 4294966784  ;;  %v23_v0 = vld [vmem:[#allocation2] sm:$0xff]  ;;  %v24_v1 = vld [vmem:[#allocation2 + $0x8] sm:$0xff]  ;;  %v140_v11 = vmov 512.0   ;;  %s141_s0 = smov [#allocation5]  }
   0x6   :  { %v25_v2 = vld [vmem:[#allocation2 + $0x10] sm:$0xff]  ;;  %v26_v3 = vld [vmem:[#allocation2 + $0x18] sm:$0xff]  ;;  %v27_v4 = vmul.f32 %v23_v0, %v23_v0  ;;  %v28_v5 = vmul.f32 %v24_v1, %v24_v1  ;;  %83 = vrcp.f32 %v140_v11  ;;  %s68_s11 = sshll.u32 %s141_s0, 4  ;;  %s70_s14 = sshll.u32 %s159_s1, 4  ;;  %s69_s11 = int_to_ptr.vmem [resolvable:$true] %s68_s11  ;;  %s71_s14 = int_to_ptr.hbm [resolvable:$true] %s70_s14 }
   0x7   :  { %v29_v6 = vmul.f32 %v25_v2, %v25_v2  ;;  %v30_v7 = vmul.f32 %v26_v3, %v26_v3 }
   0x8   :  { %v31_v8 = vadd.f32 %v28_v5, %v27_v4 }
   0xa   :  { %v32_v9 = vadd.f32 %v31_v8, %v29_v6 }
   0xc   :  { %v33_v10 = vadd.f32 %v32_v9, %v30_v7  ;;  %v84_v12 = vpop.eup %83 }
   0xd   :  { %v37_v13 = vmul.f32 512.0, %v84_v12  ;;  %vm41_vm0 = vweird.f32 %v84_v12 }
   0xe   :  { %34 = vadd.xlane.f32.xlu0 %v33_v10 }
   0xf   :  { %v38_v14 = vsub.f32 1.0, %v37_v13 }
  0x11   :  { %v39_v15 = vmul.f32 %v84_v12, %v38_v14 }
  0x13   :  { %v40_v16 = vadd.f32 %v84_v12, %v39_v15 }
  0x15   :  { %v42_v17 = vsel %vm41_vm0, %v84_v12, %v40_v16 }
  0x81   :  { %v35_v18 = vpop.xlane.xlu0 %34 }
  0x82   :  { %v43_v19 = vmul.f32 %v42_v17, %v35_v18 }
  0x84   :  { %v44_v20 = vadd.f32 1e-08, %v43_v19 }
  0x86   :  { %85 = vrsqrt.f32 %v44_v20  ;;  %vm51_vm2 = vweird.f32 %v44_v20 }
  0x8c   :  { %v86_v21 = vpop.eup %85 }
  0x8d   :  { %v46_v22 = vmul.f32 %v86_v21, %v44_v20  ;;  %vm52_vm1 = vweird.f32 %v86_v21 }
  0x8e   :  { %vm53_vm3 = vmor %vm51_vm2, %vm52_vm1 }
  0x8f   :  { %v47_v23 = vmul.f32 %v86_v21, %v46_v22 }
  0x91   :  { %v48_v24 = vmul.f32 0.5, %v47_v23 }
  0x93   :  { %v49_v25 = vsub.f32 1.5, %v48_v24 }
  0x95   :  { %v50_v26 = vmul.f32 %v86_v21, %v49_v25 }
  0x97   :  { %v54_v27 = vsel %vm53_vm3, %v86_v21, %v50_v26 }
  0x98   :  { %v55_v28 = vmul.f32 %v54_v27, %v23_v0  ;;  %v56_v29 = vmul.f32 %v54_v27, %v24_v1  ;;  %v57_v30 = vmul.f32 %v54_v27, %v25_v2  ;;  %v58_v31 = vmul.f32 %v54_v27, %v26_v3 }
  0x9a   :  { %59 = vst [vmem:[#allocation5] sm:$0xff] %v55_v28 }
  0x9b   :  { %60 = vst [vmem:[#allocation5 + $0x8] sm:$0xff] %v56_v29 }
  0x9c   :  { %61 = vst [vmem:[#allocation5 + $0x10] sm:$0xff] %v57_v30 }
  0x9d   :  { %62 = vst [vmem:[#allocation5 + $0x18] sm:$0xff] %v58_v31 }
  0x9e   :  { %73 = dma.vmem_to_hbm [thread:$0]  %s69_s11, 512, %s71_s14, [#allocation4]  }
  0x9f   :  { %137 = dma.done.wait [#allocation4], 512  }
  0xa0   :  { %138 = vsyncadd [#allocation4], 4294966784 }
  0xa1   :  { %78 = vsyncpa [#allocation3], 1 }
  0xa2   :  { %79 = vsyncpa [#allocation4], 1 }

</bundles_post_ra>
